<compile_context>
chip_gen: v7x
topology: tpu7x:2x2x1
jax: 0.10.0
libtpu: 0.0.40
codegen_flags: <defaults>
</compile_context>

<pallas_src>
import numpy as np
import jax
import jax.numpy as jnp
from jax.experimental import pallas as pl
from jax.experimental.pallas import tpu as pltpu


# ----------------------------- module buffers (as in the torch module) -----------------------------

def make_rope_buffers(d_head, n_position):
    """cos/sin buffers exactly as the torch module registers them: (P, 1, d_head)."""
    theta = 1.0 / (10000.0 ** (np.arange(0, d_head, 2, dtype=np.float32) / d_head))
    theta = np.repeat(theta, 2)                       # repeat_interleave(2)
    m = np.arange(n_position, dtype=np.float32)[:, None]
    ang = (m @ theta[None, :])[:, None, :]            # (P, 1, d_head)
    return jnp.asarray(np.cos(ang)), jnp.asarray(np.sin(ang))


def make_rope_tables(cos, sin, n_heads):
    """Kernel-ready tables, built once (like module buffers).

    sin is pre-signed per lane parity (-sin on even lanes, +sin on odd lanes) so the
    kernel only needs an adjacent-pair swap instead of strided rotate_half glue.

    Returns (cos_tab, sin_tab, folded):
      * folded=True  (d_head % 128 != 0): (P, H*D) lane-dense tables (output lane
        density matters more than the Hx table footprint at small D).
      * folded=False (d_head % 128 == 0): (P, 1, D) tables; head broadcast happens
        in-kernel, so no Hx duplication of the tables in HBM and no Hx table traffic.
    """
    _, _, D = cos.shape
    sign = np.where(np.arange(D) % 2 == 0, -1.0, 1.0).astype(np.float32)
    sin_signed = sin * jnp.asarray(sign)[None, None, :]                 # (P, 1, D)
    if D % 128 != 0:
        cos_tab = jnp.tile(cos[:, 0, :], (1, n_heads))                  # (P, H*D)
        sin_tab = jnp.tile(sin_signed[:, 0, :], (1, n_heads))           # (P, H*D)
        return cos_tab, sin_tab, True
    return cos, sin_signed, False


# ----------------------------- Pallas kernel -----------------------------

def _rope_kernel(x_ref, cos_ref, sin_ref, o_ref):
    # x block: (ts, H*D) [folded path] or (ts, H, D) [broadcast path].
    # cos/sin block: (ts, H*D) or (ts, 1, D) -- jnp broadcasting covers both.
    x = x_ref[...].astype(jnp.float32)
    last = x.shape[-1]
    ax = x.ndim - 1
    # Adjacent-pair swap via lane rotations (XLU): even lane j takes x[j+1],
    # odd lane j takes x[j-1].  Pairs never cross head boundaries (d_head is even),
    # and the circular wraparound lanes are never selected by the parity mask.
    nxt = pltpu.roll(x, shift=last - 1, axis=ax)   # lane j <- x[(j + 1) % last]
    prv = pltpu.roll(x, shift=1, axis=ax)          # lane j <- x[(j - 1) % last]
    lane = jax.lax.broadcasted_iota(jnp.int32, x.shape, ax)
    swapped = jnp.where((lane & 1) == 0, nxt, prv)
    cos = cos_ref[...].astype(jnp.float32)
    sin = sin_ref[...].astype(jnp.float32)        # pre-signed: exactly rotate_half(x)*sin
    o_ref[...] = (x * cos + swapped * sin).astype(o_ref.dtype)


# ----------------------------- tiling policy -----------------------------

def _vmem_policy():
    """(block budget bytes, vmem_limit_bytes), generation-aware."""
    cap = 128 * 1024 * 1024
    try:
        info = pltpu.get_tpu_info()
        cap = getattr(info, "vmem_capacity_bytes", cap) or cap
    except Exception:
        pass
    if cap <= 64 * 1024 * 1024:
        # v7x-class: 64 MiB per TC, 32 MiB scoped default -> stay within it.
        return 16 * 1024 * 1024, 32 * 1024 * 1024
    # v5e / v6e: 128 MiB physical; explicit limit (v5e scoped default is only 16 MiB).
    return 40 * 1024 * 1024, 64 * 1024 * 1024


def _pick_row_tile(n_rows, lane_width, itemsize, *, budget_bytes, row_cap):
    # Per row of a grid step: x + out blocks in the activation dtype, cos + sin in f32,
    # each double-buffered by the Pallas pipeline.
    per_row = 2 * (2 * lane_width * itemsize + 2 * lane_width * 4)
    max_rows = max(8, budget_bytes // max(per_row, 1))
    if n_rows <= max_rows:
        return n_rows                       # block == full dim: always legal
    sub = 8 if itemsize >= 4 else 16        # bf16: 16-row granularity
    return max(sub, min((max_rows // sub) * sub, row_cap))


# ----------------------------- wrapper -----------------------------

def rope_forward(x, cos_tab, sin_tab, folded, *, donate_x=False):
    """x: (B, S, H, D); cos_tab/sin_tab from make_rope_tables.  Returns x's shape/dtype."""
    B, S, H, D = x.shape
    P = cos_tab.shape[0]
    assert S <= P, f"sequence length {S} exceeds n_position {P}"
    assert D % 2 == 0, "d_head must be even for interleaved RoPE"

    budget, limit = _vmem_policy()
    row_cap = 1024 if limit <= 32 * 1024 * 1024 else 2048
    ts = _pick_row_tile(S, H * D, jnp.dtype(x.dtype).itemsize,
                        budget_bytes=budget, row_cap=row_cap)
    if B == 1 and ts >= S and S >= 16:
        # Ensure >= 2 grid tiles so v7x's two TensorCores both get work.
        ts = max(8, ((((S + 1) // 2) + 7) // 8) * 8)

    # Batch innermost: cos/sin block index is constant across consecutive grid steps,
    # so their DMAs are skipped instead of re-streamed once per batch element.
    grid = (pl.cdiv(S, ts), B)

    kwargs = dict(
        compiler_params=pltpu.CompilerParams(
            dimension_semantics=("parallel", "parallel"),
            vmem_limit_bytes=limit,
        ),
    )
    if donate_x:
        kwargs["input_output_aliases"] = {0: 0}   # optional in-place RoPE on q/k

    cos_s = cos_tab[:S]
    sin_s = sin_tab[:S]

    if folded:
        HD = H * D
        x2 = x.reshape(B, S, HD)            # contiguous dim merge, no transpose
        out = pl.pallas_call(
            _rope_kernel,
            out_shape=jax.ShapeDtypeStruct((B, S, HD), x.dtype),
            grid=grid,
            in_specs=[
                pl.BlockSpec((None, ts, HD), lambda s, b: (b, s, 0)),
                pl.BlockSpec((ts, HD), lambda s, b: (s, 0)),
                pl.BlockSpec((ts, HD), lambda s, b: (s, 0)),
            ],
            out_specs=pl.BlockSpec((None, ts, HD), lambda s, b: (b, s, 0)),
            **kwargs,
        )(x2, cos_s, sin_s)
        return out.reshape(B, S, H, D)

    # d_head is a multiple of 128: lane-dense (ts, H, D) blocks, cos/sin stay (ts, 1, D)
    # and broadcast over heads in-kernel (sublane broadcast).
    out = pl.pallas_call(
        _rope_kernel,
        out_shape=jax.ShapeDtypeStruct((B, S, H, D), x.dtype),
        grid=grid,
        in_specs=[
            pl.BlockSpec((None, ts, H, D), lambda s, b: (b, s, 0, 0)),
            pl.BlockSpec((ts, 1, D), lambda s, b: (s, 0, 0)),
            pl.BlockSpec((ts, 1, D), lambda s, b: (s, 0, 0)),
        ],
        out_specs=pl.BlockSpec((None, ts, H, D), lambda s, b: (b, s, 0, 0)),
        **kwargs,
    )(x, cos_s, sin_s)
    return out


# ----------------------------- pure-JAX reference (mirrors the torch module) -----------------------------

def _rotate_half_ref(x):
    x1 = x[..., 0::2]
    x2 = x[..., 1::2]
    return jnp.stack([-x2, x1], axis=-1).reshape(x.shape)


def rope_reference(x, cos, sin):
    S = x.shape[-3]
    return x * cos[:S] + _rotate_half_ref(x) * sin[:S]


# ----------------------------- main -----------------------------

if __name__ == "__main__":
    key = jax.random.PRNGKey(0)
    k1, k2 = jax.random.split(key, 2)
    n_position = 100
    B, S = 2, 8

    # --- Config 1: torch defaults d_head=64, H=4 -> folded (P, H*D) lane-dense path ---
    d_head, H = 64, 4
    cos, sin = make_rope_buffers(d_head, n_position)             # (P, 1, D) module buffers
    cos_tab, sin_tab, folded = make_rope_tables(cos, sin, H)
    x = jax.random.normal(k1, (B, S, H, d_head), jnp.float32)
    out = jax.block_until_ready(rope_forward(x, cos_tab, sin_tab, folded))
    ref = rope_reference(x, cos, sin)
    np.testing.assert_allclose(np.asarray(out), np.asarray(ref), rtol=1e-6, atol=1e-6)

    # bf16 I/O path (halves HBM traffic for this mem-bound kernel); compute is f32 in-kernel.
    xb = x.astype(jnp.bfloat16)
    outb = jax.block_until_ready(rope_forward(xb, cos_tab, sin_tab, folded))
    refb = rope_reference(xb.astype(jnp.float32), cos, sin)
    np.testing.assert_allclose(np.asarray(outb.astype(jnp.float32)), np.asarray(refb),
                               rtol=3e-2, atol=3e-2)

    # --- Config 2: d_head=128, H=2 -> un-folded (P, 1, D) tables + in-kernel head broadcast ---
    d_head2, H2 = 128, 2
    cos2, sin2 = make_rope_buffers(d_head2, n_position)
    cos_tab2, sin_tab2, folded2 = make_rope_tables(cos2, sin2, H2)
    x2 = jax.random.normal(k2, (B, S, H2, d_head2), jnp.float32)
    out2 = jax.block_until_ready(rope_forward(x2, cos_tab2, sin_tab2, folded2))
    ref2 = rope_reference(x2, cos2, sin2)
    np.testing.assert_allclose(np.asarray(out2), np.asarray(ref2), rtol=1e-6, atol=1e-6)

    print("KERNEL_OK")
</pallas_src>

<mosaic_0001>
module attributes {stable_mosaic.version = 11 : i64} {
  func.func @_rope_kernel(%arg0: i32, %arg1: i32, %arg2: memref<1x8x256xf32, #tpu.memory_space<vmem>>, %arg3: memref<8x256xf32, #tpu.memory_space<vmem>>, %arg4: memref<8x256xf32, #tpu.memory_space<vmem>>, %arg5: memref<1x8x256xf32, #tpu.memory_space<vmem>>) attributes {dimension_semantics = [#tpu.dimension_semantics<parallel>, #tpu.dimension_semantics<parallel>], iteration_bounds = array<i64: 1, 2>, scalar_prefetch = 0 : i64, scratch_operands = 0 : i64, tpu.core_type = #tpu.core_type<tc>, window_params = [{transform_indices = @transform_0, window_bounds = array<i64: 1, 8, 256>}, {transform_indices = @transform_1, window_bounds = array<i64: 8, 256>}, {transform_indices = @transform_2, window_bounds = array<i64: 8, 256>}, {transform_indices = @transform_3, window_bounds = array<i64: 1, 8, 256>}]} {
    %c0 = arith.constant 0 : index
    %c0_0 = arith.constant 0 : index
    %c0_1 = arith.constant 0 : index
    %0 = vector.load %arg2[%c0, %c0_0, %c0_1] : memref<1x8x256xf32, #tpu.memory_space<vmem>>, vector<1x8x256xf32>
    %1 = vector.shape_cast %0 : vector<1x8x256xf32> to vector<8x256xf32>
    %c255_i32 = arith.constant 255 : i32
    %2 = tpu.dynamic_rotate %1 by %c255_i32 dim 1 : vector<8x256xf32>, i32 -> vector<8x256xf32>
    %c1_i32 = arith.constant 1 : i32
    %3 = tpu.dynamic_rotate %1 by %c1_i32 dim 1 : vector<8x256xf32>, i32 -> vector<8x256xf32>
    %4 = tpu.iota {dimensions = array<i32: 1>} : vector<8x256xi32>
    %c1_i32_2 = arith.constant 1 : i32
    %5 = vector.broadcast %c1_i32_2 : i32 to vector<8x256xi32>
    %6 = arith.andi %4, %5 : vector<8x256xi32>
    %c0_i32 = arith.constant 0 : i32
    %7 = vector.broadcast %c0_i32 : i32 to vector<8x256xi32>
    %8 = arith.cmpi eq, %6, %7 : vector<8x256xi32>
    %9 = arith.select %8, %2, %3 : vector<8x256xi1>, vector<8x256xf32>
    %c0_3 = arith.constant 0 : index
    %c0_4 = arith.constant 0 : index
    %10 = vector.load %arg3[%c0_3, %c0_4] : memref<8x256xf32, #tpu.memory_space<vmem>>, vector<8x256xf32>
    %c0_5 = arith.constant 0 : index
    %c0_6 = arith.constant 0 : index
    %11 = vector.load %arg4[%c0_5, %c0_6] : memref<8x256xf32, #tpu.memory_space<vmem>>, vector<8x256xf32>
    %12 = arith.mulf %1, %10 : vector<8x256xf32>
    %13 = arith.mulf %9, %11 : vector<8x256xf32>
    %14 = arith.addf %12, %13 : vector<8x256xf32>
    %c0_7 = arith.constant 0 : index
    %c0_8 = arith.constant 0 : index
    %c0_9 = arith.constant 0 : index
    %15 = vector.load %arg5[%c0_7, %c0_8, %c0_9] : memref<1x8x256xf32, #tpu.memory_space<vmem>>, vector<1x8x256xf32>
    %16 = vector.shape_cast %15 : vector<1x8x256xf32> to vector<8x256xf32>
    %17 = vector.shape_cast %14 : vector<8x256xf32> to vector<1x8x256xf32>
    tpu.vector_store %arg5[%c0_7, %c0_8, %c0_9], %17 {strides = array<i32>} : memref<1x8x256xf32, #tpu.memory_space<vmem>>, vector<1x8x256xf32>,
    return
  }
  func.func @transform_0(%arg0: i32, %arg1: i32) -> (i32, i32, i32) {
    %c0_i32 = arith.constant 0 : i32
    %c0_i32_0 = arith.constant 0 : i32
    return %arg1, %arg0, %c0_i32 : i32, i32, i32
  }
  func.func @transform_1(%arg0: i32, %arg1: i32) -> (i32, i32) {
    %c0_i32 = arith.constant 0 : i32
    %c0_i32_0 = arith.constant 0 : i32
    return %arg0, %c0_i32 : i32, i32
  }
  func.func @transform_2(%arg0: i32, %arg1: i32) -> (i32, i32) {
    %c0_i32 = arith.constant 0 : i32
    %c0_i32_0 = arith.constant 0 : i32
    return %arg0, %c0_i32 : i32, i32
  }
  func.func @transform_3(%arg0: i32, %arg1: i32) -> (i32, i32, i32) {
    %c0_i32 = arith.constant 0 : i32
    %c0_i32_0 = arith.constant 0 : i32
    return %arg1, %arg0, %c0_i32 : i32, i32, i32
  }
}

</mosaic_0001>

<bundles_post_ra>
// kernel: tpu_custom_call.1
= control target key start
LH: loop header
LB: loop body
LE: loop exit
PB: predicated region body
PF: predicated region fallthrough
CT: control target
= control target key end

     0   :  { %8 = vsyncpa [#allocation3], 0  ;;  %s972_s0 = inlined_call_operand.hbm [shape: f32[2,8,256], index: 0, kind: input, shape index: {}]   ;;  %s973_s1 = inlined_call_operand.hbm [shape: f32[8,256], index: 1, kind: input, shape index: {}]   ;;  %s974_s2 = inlined_call_operand.hbm [shape: f32[8,256], index: 2, kind: input, shape index: {}]   ;;  %s975_s3 = inlined_call_operand.hbm [shape: f32[2,8,256], index: 3, kind: output, shape index: {}]  }
   0x1   :  { %10 = vsyncpa [#allocation3 + $0x1], 0 }
   0x2   :  { %11 = vsyncpa [#allocation6], 0 }
   0x3   :  { %12 = vsyncpa [#allocation4], 0 }
   0x4   :  { %14 = vsyncpa [#allocation4 + $0x1], 0  ;;  %s713_s12 = smov 0   ;;  %s715_s13 = smov 0  }
   0x5   :  { %s717_s14 = smov 0   ;;  %s719_s15 = smov 0  }
   0x6   :  { %s721_s16 = smov 0   ;;  %s723_s17 = smov 0  }
   0x7 LB: > { %s407_s18 = sadd.s32 4294967295, %s685_s17   ;;  %s408_s19 = sadd.s32 4294967294, %s685_s17   ;;  %s685_s17 = sphi %s723_s17, %s20_s17   ;;  %s681_s16 = sphi %s721_s16, %s1002_s16   ;;  %s677_s15 = sphi %s719_s15, %s1001_s15   ;;  %s673_s14 = sphi %s717_s14, %s1000_s14   ;;  %s669_s13 = sphi %s715_s13, %s999_s13   ;;  %s665_s12 = sphi %s713_s12, %s998_s12  }
   0x8   : > { %p54_p0 = scmp.ne.s32.totalorder %s669_s13, %s665_s12  ;;  %p747_p1 = scmp.eq.s32.totalorder %s407_s18, 0 }
   0x9   : > { %p751_p2 = scmp.eq.s32.totalorder %s407_s18, 1  ;;  %p138_p3 = scmp.eq.s32.totalorder %s408_s19, 1 }
   0xa   : > { %s980_s20 = scalar_select %p747_p1, 1, 0 }
   0xb   : > { %s981_s21 = scalar_select %p751_p2, 1, 0 }
   0xc   : > { %p757_p4 = por %p747_p1, %p54_p0  ;;  %p409_p5 = scmp.ge.s32.totalorder %s685_s17, 1 }
   0xd   : > { %p762_p6 = por %p138_p3, %p54_p0  ;;  %p145_p7 = scmp.lt.s32.totalorder %s685_s17, 3 }
   0xe   : > { %s982_s22 = scalar_select %p757_p4, 1, 0 }
   0xf   : > { %s983_s23 = scalar_select %p762_p6, 1, 0 }
  0x10   : > { %p767_p8 = pnand %p409_p5, %p145_p7  ;;  %s687_s25 = smov [#allocation5]  }
  0x11   : > { %s161_s26 = sshll.u32 %s687_s25, 4  ;;  %s688_s27 = smov [#allocation7]   ;;  %s162_s26 = int_to_ptr.vmem [resolvable:$true] %s161_s26 }
  0x12   : > { %s984_s24 = scalar_select %p767_p8, 1, 0 }
  0x13   : > { %p440_p10 = pneg %p767_p8  ;;  %s175_s28 = sshll.u32 %s688_s27, 4  ;;  %s780_s28 = int_to_ptr.vmem [resolvable:$true] %s175_s28 }
  0x14   : > { %s513_s5 = scalar_lea.hbm %s973_s1, 256 }
  0x15   : > { %p776_p11 = pnand %p440_p10, %p747_p1  ;;  %p514_p12 = scmp.ne.s32.totalorder %s973_s1, %s513_s5 }
  0x16   : > { %p520_p5 = scmp.lt.u32.totalorder %s513_s5, %s973_s1 }
  0x17   : > { %p515_p13 = pneg %p776_p11 }
  0x19   : > { %p516_p0 = pnand %p515_p13, %p514_p12 }
  0x1b   : > { %p517_p3 = pneg %p516_p0 }
  0x1d   : > { %p522_p7 = pnand %p520_p5, %p517_p3 }
  0x1f   : > { %525 = shalt.err (!%p522_p7)
}
  0x20   : > { %s526_s10 = scalar_lea.vmem %s162_s26, 256  ;;  %p534_p1 = scmp.lt.s32.totalorder %s162_s26, %s162_s26 }
  0x21   : > { %p527_p10 = scmp.ne.s32.totalorder %s162_s26, %s526_s10  ;;  %p535_p4 = scmp.lt.s32.totalorder %s526_s10, %s526_s10 }
  0x23   : > { %p529_p9 = pnand %p527_p10, %p515_p13  ;;  %p536_p8 = por %p535_p4, %p534_p1 }
  0x25   : > { %p530_p6 = pneg %p529_p9 }
  0x27   : > { %p537_p2 = pnand %p536_p8, %p530_p6 }
  0x29   : > { %540 = shalt.err (!%p537_p2)
}
  0x2a   : > { %443 = dma.hbm_to_vmem [thread:$0]  (!%p776_p11), %s973_s1, 256, %s162_s26, [#allocation6]  }
  0x2b   : > { %s541_s27 = scalar_lea.hbm %s974_s2, 256 }
  0x2c   : > { %p542_p9 = scmp.ne.s32.totalorder %s974_s2, %s541_s27  ;;  %p548_p2 = scmp.lt.u32.totalorder %s541_s27, %s974_s2 }
  0x2e   : > { %p544_p1 = pnand %p542_p9, %p515_p13 }
  0x30   : > { %p545_p4 = pneg %p544_p1 }
  0x32   : > { %p550_p6 = pnand %p548_p2, %p545_p4 }
  0x34   : > { %553 = shalt.err (!%p550_p6)
}
  0x35   : > { %s554_s26 = scalar_lea.vmem %s780_s28, 256  ;;  %p562_p3 = scmp.lt.s32.totalorder %s780_s28, %s780_s28 }
  0x36   : > { %p555_p8 = scmp.ne.s32.totalorder %s780_s28, %s554_s26  ;;  %p563_p5 = scmp.lt.s32.totalorder %s554_s26, %s554_s26 }
  0x38   : > { %p557_p12 = pnand %p555_p8, %p515_p13  ;;  %p564_p7 = por %p563_p5, %p562_p3 }
  0x3a   : > { %p558_p0 = pneg %p557_p12 }
  0x3c   : > { %p565_p10 = pnand %p564_p7, %p558_p0 }
  0x3e   : > { %568 = shalt.err (!%p565_p10)
}
  0x3f   : > { %446 = dma.hbm_to_vmem [thread:$0]  (!%p776_p11), %s974_s2, 256, %s780_s28, [#allocation6]  }
  0x40   : > { %s29_s9 = sadd.s32 1, %s681_s16  ;;  %s41_s10 = sadd.s32 1, %s673_s14 }
  0x41   : > { %p30_p13 = scmp.ge.s32.totalorder %s29_s9, 2  ;;  %p48_p9 = scmp.ne.s32.totalorder %s673_s14, %s669_s13 }
  0x42   : > { %p49_p1 = scmp.eq.s32.totalorder %s685_s17, 0  ;;  %p457_p4 = scmp.lt.s32.totalorder %s685_s17, 2 }
  0x43   : > { %s1004_s9 = smov (%p30_p13, %s29_s9), 0  ;;  %p986_p6 = scmp.ne.s32.totalorder %s981_s21, 0 }
  0x44   : > { %p50_p2 = por %p49_p1, %p48_p9  ;;  %s36_s11 = ssub.s32 %s681_s16, %s1004_s9 }
  0x45   : > { %p839_p8 = por %p986_p6, %p48_p9  ;;  %s186_s18 = sand.u32 1, %s673_s14  }
  0x46   : > { %p39_p12 = scmp.eq.s32.totalorder %s36_s11, 0  ;;  %s413_s28 = sshll.u32 %s186_s18, 4 }
  0x47   : > { %s426_s19 = sshll.u32 %s681_s16, 8  ;;  %s190_s21 = scalar_lea.vmem [#allocation2], %s413_s28 }
  0x48   : > { %s848_s25 = scalar_select %p39_p12, %s673_s14, %s41_s10  }
  0x49   : > { %s853_s4 = scalar_lea.hbm %s972_s0, %s426_s19  ;;  %s200_s5 = sshll.u32 %s190_s21, 4  ;;  %s861_s5 = int_to_ptr.vmem [resolvable:$true] %s200_s5 }
  0x4a   : > { %p857_p11 = pnand %p457_p4, %p50_p2  ;;  %s187_s26 = scalar_lea.sflag [#allocation3], %s186_s18 }
  0x4b   : > { %s569_s7 = scalar_lea.hbm %s853_s4, 256  ;;  %s574_s11 = scalar_lea.hbm %s972_s0, 512 }
  0x4c   : > { %p570_p0 = scmp.ne.s32.totalorder %s853_s4, %s569_s7  ;;  %p571_p3 = pneg %p857_p11 }
  0x4d   : > { %p575_p10 = scmp.lt.u32.totalorder %s853_s4, %s972_s0  ;;  %p576_p13 = scmp.lt.u32.totalorder %s574_s11, %s569_s7 }
  0x4e   : > { %p572_p5 = pnand %p571_p3, %p570_p0  ;;  %p578_p1 = scmp.lt.u32.totalorder %s569_s7, %s853_s4 }
  0x4f   : > { %p577_p9 = por %p576_p13, %p575_p10 }
  0x50   : > { %p573_p7 = pneg %p572_p5 }
  0x51   : > { %p579_p4 = por %p578_p1, %p577_p9 }
  0x53   : > { %p580_p2 = pnand %p579_p4, %p573_p7 }
  0x55   : > { %583 = shalt.err (!%p580_p2)
}
  0x56   : > { %s584_s18 = scalar_lea.vmem %s861_s5, 256  ;;  %s689_s27 = smov [#allocation2]  }
  0x57   : > { %p585_p6 = scmp.ne.s32.totalorder %s861_s5, %s584_s18  ;;  %s589_s30 = sshll.u32 %s689_s27, 4  ;;  %s590_s30 = int_to_ptr.vmem [resolvable:$false] %s589_s30 }
  0x58   : > { %s591_s21 = scalar_lea.vmem %s590_s30, 512  ;;  %p592_p5 = scmp.lt.s32.totalorder %s861_s5, %s590_s30 }
  0x59   : > { %p587_p12 = pnand %p585_p6, %p571_p3  ;;  %p593_p10 = scmp.lt.s32.totalorder %s591_s21, %s584_s18 }
  0x5b   : > { %p588_p0 = pneg %p587_p12  ;;  %p594_p13 = por %p593_p10, %p592_p5 }
  0x5d   : > { %p595_p9 = pnand %p594_p13, %p588_p0 }
  0x5f   : > { %598 = shalt.err (!%p595_p9)
}
  0x60   : > { %450 = dma.hbm_to_vmem [thread:$0]  (!%p857_p11), %s853_s4, 256, %s861_s5, %s187_s26  }
  0x61   : > { %p989_p7 = scmp.ne.s32.totalorder %s984_s24, 0 }
  0x62   : > { %s891_s7 = sand.u32 (!%p989_p7), 1, %s669_s13   ;;  %p990_p3 = scmp.ne.s32.totalorder (!%p989_p7), %s982_s22, 0 }
  0x63   : > { %209 = sbr.rel (%p989_p7) target bundleno = 250 (0xfa), region = 32  ;;  %s417_s8 = sshll.u32 (!%p989_p7), %s891_s7, 4 }
  0x64   : > { %s212_s10 = scalar_lea.sflag (!%p989_p7), [#allocation3], %s891_s7  ;;  %s215_s11 = scalar_lea.vmem (!%p989_p7), [#allocation2], %s417_s8 }
  0x6a   : > { %652 = dma.done.wait (%p990_p3), %s212_s10, 256  }
  0x6b   : > { %654 = vsyncadd (%p990_p3), %s212_s10, 4294967040  ;;  %p991_p11 = scmp.ne.s32.totalorder %s980_s20, 0 }
  0x6d   : > { %656 = dma.done.wait (%p991_p11), [#allocation6], 512  }
  0x6e   : > { %658 = vsyncadd (%p991_p11), [#allocation6], 4294966784  ;;  %v246_v0 = vld [vmem:[%s215_s11] sm:$0xff]  ;;  %s690_s24 = smov 1   ;;  %s691_s4 = smov 127   ;;  %v247_v1 = vld [vmem:[%s215_s11 + $0x8] sm:$0xff]  ;;  %v252_v2 = vlaneseq }
  0x6f   : > { %257 = vrot.lane.b32.xlu1 %v246_v0, %s690_s24  ;;  %248 = vrot.lane.b32.xlu0 %v246_v0, %s691_s4  ;;  %v271_v9 = vld [vmem:[#allocation5] sm:$0xff]  ;;  %v272_v10 = vld [vmem:[#allocation5 + $0x8] sm:$0xff]  ;;  %v273_v16 = vld [vmem:[#allocation7] sm:$0xff]  ;;  %s427_s20 = sshll.u32 %s677_s15, 8  ;;  %s245_s22 = scalar_lea.vmem [#allocation8], %s417_s8 }
  0x70   : > { %v253_v3 = vand.u32 127, %v252_v2  ;;  %v275_v13 = vmul.f32 %v271_v9, %v246_v0  ;;  %v276_v14 = vmul.f32 %v272_v10, %v247_v1  ;;  %v274_v17 = vld [vmem:[#allocation7 + $0x8] sm:$0xff]  ;;  %s300_s5 = sshll.u32 %s245_s22, 4  ;;  %s923_s28 = scalar_lea.hbm %s975_s3, %s427_s20  ;;  %s925_s5 = int_to_ptr.vmem [resolvable:$true] %s300_s5 }
  0x71   : > { %s284_s15 = scalar_lea.sflag [#allocation4], %s891_s7  ;;  %s599_s19 = scalar_lea.vmem %s925_s5, 256 }
  0x72   : > { %v264_v4 = vadd.s32 128, %v253_v3  ;;  %v265_v5 = vand.u32 1, %v253_v3  ;;  %vm261_vm0 = vcmp.lt.s32.totalorder %v253_v3, 1  ;;  %vm254_vm1 = vcmp.lt.s32.totalorder %v253_v3, 127  ;;  %p600_p1 = scmp.ne.s32.totalorder %s925_s5, %s599_s19  ;;  %s692_s18 = smov [#allocation8]  }
  0x73   : > { %259 = vrot.lane.b32.xlu1 %v247_v1, %s690_s24  ;;  %250 = vrot.lane.b32.xlu0 %v247_v1, %s691_s4  ;;  %s603_s27 = sshll.u32 %s692_s18, 4  ;;  %s604_s27 = int_to_ptr.vmem [resolvable:$false] %s603_s27 }
  0x74   : > { %v266_v6 = vand.u32 1, %v264_v4  ;;  %vm905_vm2 = vcmp.eq.s32.totalorder %v265_v5, 0  ;;  %p601_p4 = pnand %p600_p1, %p839_p8  ;;  %s605_s30 = scalar_lea.vmem %s604_s27, 512 }
  0x75   : > { %p606_p6 = scmp.lt.s32.totalorder %s925_s5, %s604_s27  ;;  %p607_p12 = scmp.lt.s32.totalorder %s605_s30, %s599_s19 }
  0x76   : > { %vm909_vm3 = vcmp.eq.s32.totalorder %v266_v6, 0  ;;  %p602_p2 = pneg %p601_p4 }
  0x77   : > { %p608_p0 = por %p607_p12, %p606_p6 }
  0x79   : > { %p609_p5 = pnand %p608_p0, %p602_p2 }
  0xe1   : > { %v258_v7 = vpop.permute.xlu1 %257  ;;  %v249_v8 = vpop.permute.xlu0 %248 }
  0xe5   : > { %v260_v15 = vpop.permute.xlu1 %259  ;;  %v251_v18 = vpop.permute.xlu0 %250 }
  0xe6   : > { %v262_v19 = vsel %vm261_vm0, %v258_v7, %v260_v15  ;;  %v263_v20 = vsel %vm261_vm0, %v260_v15, %v258_v7  ;;  %v255_v21 = vsel %vm254_vm1, %v249_v8, %v251_v18  ;;  %v256_v22 = vsel %vm254_vm1, %v251_v18, %v249_v8 }
  0xe7   : > { %v269_v23 = vsel %vm905_vm2, %v255_v21, %v263_v20  ;;  %v270_v24 = vsel %vm909_vm3, %v256_v22, %v262_v19 }
  0xe8   : > { %v277_v25 = vmul.f32 %v273_v16, %v269_v23  ;;  %v278_v26 = vmul.f32 %v274_v17, %v270_v24 }
  0xea   : > { %v279_v27 = vadd.f32 %v277_v25, %v275_v13  ;;  %v280_v28 = vadd.f32 %v278_v26, %v276_v14 }
  0xec   : > { %281 = vst [vmem:[%s245_s22] sm:$0xff] %v279_v27  ;;  %282 = vst [vmem:[%s245_s22 + $0x8] sm:$0xff] %v280_v28 }
  0xed   : > { %612 = shalt.err (!%p609_p5)
}
  0xee   : > { %s613_s21 = scalar_lea.hbm %s923_s28, 256  ;;  %s617_s10 = scalar_lea.hbm %s975_s3, 512 }
  0xef   : > { %p614_p10 = scmp.ne.s32.totalorder %s923_s28, %s613_s21  ;;  %p618_p7 = scmp.lt.u32.totalorder %s923_s28, %s975_s3 }
  0xf0   : > { %p619_p3 = scmp.lt.u32.totalorder %s617_s10, %s613_s21  ;;  %p621_p1 = scmp.lt.u32.totalorder %s613_s21, %s923_s28 }
  0xf1   : > { %p615_p13 = pnand %p614_p10, %p839_p8 }
  0xf2   : > { %p620_p11 = por %p619_p3, %p618_p7 }
  0xf3   : > { %p616_p9 = pneg %p615_p13 }
  0xf4   : > { %p622_p4 = por %p621_p1, %p620_p11 }
  0xf6   : > { %p623_p2 = pnand %p622_p4, %p616_p9 }
  0xf8   : > { %626 = shalt.err (!%p623_p2)
}
  0xf9   : > { %438 = dma.vmem_to_hbm [thread:$0]  (%p839_p8), %s925_s5, 256, %s923_s28, %s284_s15  }
  0xfa PF: > { %s312_s4 = sand.u32 1, %s665_s12   ;;  %p996_p6 = scmp.ne.s32.totalorder %s983_s23, 0 }
  0xfb   : > { %p997_p12 = scmp.ge.s32.totalorder %s685_s17, 2  ;;  %s313_s20 = scalar_lea.sflag [#allocation4], %s312_s4 }
  0xfd   : > { %p452_p0 = pnand %p997_p12, %p996_p6 }
  0xff   : > { %660 = dma.done.wait (!%p452_p0), %s313_s20, 256  }
 0x100   : > { %662 = vsyncadd (!%p452_p0), %s313_s20, 4294967040  ;;  %s20_s17 = sadd.s32 1, %s685_s17   ;;  %s998_s12 = smov %s669_s13 }
 0x101   : > { %p17_p5 = scmp.ge.s32.totalorder %s20_s17, 4   ;;  %s999_s13 = smov %s673_s14 }
 0x102   : > { %s1000_s14 = smov %s848_s25  ;;  %s1001_s15 = smov %s681_s16 }
 0x103   : > { %s1002_s16 = smov %s1004_s9  ;;  %19 = sbr.rel (!%p17_p5) target bundleno = 7 (0x7), region = 87 }
 0x10a   :  { %318 = vsyncpa [#allocation3], 1 }
 0x10b   :  { %320 = vsyncpa [#allocation3 + $0x1], 1 }
 0x10c   :  { %321 = vsyncpa [#allocation6], 1 }
 0x10d   :  { %322 = vsyncpa [#allocation4], 1 }
 0x10e   :  { %324 = vsyncpa [#allocation4 + $0x1], 1 }

</bundles_post_ra>
